<compile_context>
chip_gen: v5e
topology: v5e:2x2
jax: 0.10.0
libtpu: 0.0.40
codegen_flags: <defaults>
</compile_context>

<pallas_src>
import math

import jax
import jax.numpy as jnp
from jax import lax
from jax.experimental import pallas as pl
from jax.experimental.pallas import tpu as pltpu

_INV_SQRT2 = 1.0 / math.sqrt(2.0)


def _cmlp_kernel(x_ref, w1_ref, b1_ref, w2_ref, b2_ref, o_ref):
    # x_ref:(tm,Cin)  w1_ref:(Cin,H)  b1_ref:(1,H)  w2_ref:(H,Cout)  b2_ref:(1,Cout)
    # MXU matmuls with f32 accumulation; bias add + GELU in f32.
    h = jnp.dot(x_ref[...], w1_ref[...], preferred_element_type=jnp.float32)
    h = h + b1_ref[...]
    # exact erf-based GELU == torch.nn.GELU() default.
    # TODO(synk): use tanh-approx GELU (EUP slot) if parity with exact erf may be relaxed.
    h = 0.5 * h * (1.0 + lax.erf(h * _INV_SQRT2))
    # dropout(p=0.0) is identity -> nothing to do.
    o = jnp.dot(h.astype(w2_ref.dtype), w2_ref[...],
                preferred_element_type=jnp.float32) + b2_ref[...]
    o_ref[...] = o.astype(o_ref.dtype)


def _round_up(v, mult):
    return (v + mult - 1) // mult * mult


def _pad_channel(dim):
    # Lane-dense padding (multiple of 128) only when the dim already exceeds 128;
    # small dims use the full extent (legal: block dim == full array dim).
    if dim > 128 and dim % 128 != 0:
        return _round_up(dim, 128)
    return dim


def cmlp_forward(x, w1, b1, w2, b2, *, tm_max=512, use_bf16_matmul=True):
    """x: (seq, batch, C_in) f32.  w1:(C_in,H) b1:(H,) w2:(H,C_out) b2:(C_out,).

    Returns (seq, batch, C_out) in x.dtype."""
    seq, batch, c_in = x.shape
    hidden = w1.shape[1]
    c_out = w2.shape[1]
    m = seq * batch

    # ---- balanced row tiles: minimal M padding (<8 wasted rows per tile).
    n_tiles = max(1, -(-m // tm_max))
    tm = _round_up(-(-m // n_tiles), 8)
    m_pad = n_tiles * tm

    # ---- channel padding (exact: zero x cols hit zero W1 rows, GELU(0)=0 hits zero
    #      W2 rows, padded output cols are sliced off).
    c_in_p = _pad_channel(c_in)
    hid_p = _pad_channel(hidden)
    c_out_p = _pad_channel(c_out)

    in_dtype = jnp.bfloat16 if use_bf16_matmul else x.dtype
    in_bytes = jnp.dtype(in_dtype).itemsize
    out_bytes = jnp.dtype(x.dtype).itemsize

    x2d = x.reshape(m, c_in)
    if (m_pad, c_in_p) != (m, c_in):
        x2d = jnp.pad(x2d, ((0, m_pad - m), (0, c_in_p - c_in)))
    x_p = x2d.astype(in_dtype)

    w1_p = w1 if (c_in_p, hid_p) == (c_in, hidden) else jnp.pad(
        w1, ((0, c_in_p - c_in), (0, hid_p - hidden)))
    w2_p = w2 if (hid_p, c_out_p) == (hidden, c_out) else jnp.pad(
        w2, ((0, hid_p - hidden), (0, c_out_p - c_out)))
    w1_p = w1_p.astype(in_dtype)
    w2_p = w2_p.astype(in_dtype)

    b1_p = b1.reshape(1, hidden)
    if hid_p != hidden:
        b1_p = jnp.pad(b1_p, ((0, 0), (0, hid_p - hidden)))
    b2_p = b2.reshape(1, c_out)
    if c_out_p != c_out:
        b2_p = jnp.pad(b2_p, ((0, 0), (0, c_out_p - c_out)))

    # ---- scheduler hint (erf is a VALU polynomial, not a transcendental unit op).
    cost = pl.CostEstimate(
        flops=2 * m_pad * (c_in_p * hid_p + hid_p * c_out_p) + 10 * m_pad * hid_p,
        transcendentals=0,
        bytes_accessed=(in_bytes * (m_pad * c_in_p + c_in_p * hid_p + hid_p * c_out_p)
                        + 4 * (hid_p + c_out_p)
                        + out_bytes * m_pad * c_out_p),
    )

    # ---- VMEM: single-buffered weights + double-buffered x/out tiles + f32 intermediate.
    #      Raise scoped limit only if needed; cap below the generation's physical VMEM.
    vmem_need = (2 * tm * c_in_p * in_bytes + 2 * tm * c_out_p * out_bytes
                 + in_bytes * (c_in_p * hid_p + hid_p * c_out_p)
                 + 4 * (hid_p + c_out_p) + 4 * tm * hid_p)
    vmem_limit = None
    if vmem_need > 16 * 2 ** 20:
        try:
            phys = pltpu.get_tpu_info().vmem_capacity_bytes
        except Exception:
            phys = 64 * 2 ** 20  # conservative: v7x per-TC physical VMEM
        vmem_limit = int(min(max(vmem_need * 5 // 4, 16 * 2 ** 20), phys * 3 // 4))

    resident = lambda i: (0, 0)  # grid-invariant operands

    out_p = pl.pallas_call(
        _cmlp_kernel,
        out_shape=jax.ShapeDtypeStruct((m_pad, c_out_p), x.dtype),
        grid_spec=pltpu.PrefetchScalarGridSpec(
            num_scalar_prefetch=0,
            grid=(m_pad // tm,),
            in_specs=[
                pl.BlockSpec((tm, c_in_p), lambda i: (i, 0)),               # x tile
                pl.BlockSpec((c_in_p, hid_p), resident,
                             pipeline_mode=pl.Buffered(1)),                 # W1
                pl.BlockSpec((1, hid_p), resident,
                             pipeline_mode=pl.Buffered(1)),                 # b1
                pl.BlockSpec((hid_p, c_out_p), resident,
                             pipeline_mode=pl.Buffered(1)),                 # W2
                pl.BlockSpec((1, c_out_p), resident,
                             pipeline_mode=pl.Buffered(1)),                 # b2
            ],
            out_specs=pl.BlockSpec((tm, c_out_p), lambda i: (i, 0)),
        ),
        compiler_params=pltpu.CompilerParams(
            dimension_semantics=("parallel",),
            vmem_limit_bytes=vmem_limit,
        ),
        cost_estimate=cost,
    )(x_p, w1_p, b1_p, w2_p, b2_p)

    if (m_pad, c_out_p) != (m, c_out):
        out_p = out_p[:m, :c_out]
    return out_p.reshape(seq, batch, c_out)


def _reference(x, w1, b1, w2, b2):
    h = x @ w1 + b1
    h = 0.5 * h * (1.0 + lax.erf(h * _INV_SQRT2))
    return h @ w2 + b2


if __name__ == "__main__":
    # Module config: in_features=32, hidden_features=64, out_features=32, drop=0.0
    in_features = 32
    hidden_features = 64
    out_features = 32
    seq, batch = 16, 2  # x.shape[0] ** 0.5 is computed in the torch forward but unused

    key = jax.random.PRNGKey(0)
    kx, k1, k2, k3, k4 = jax.random.split(key, 5)

    x = jax.random.normal(kx, (seq, batch, in_features), dtype=jnp.float32)

    # Deterministic parameter init (PyTorch-Linear-like uniform fan-in scaling),
    # pre-transposed to (in, out) layout.
    bound1 = 1.0 / math.sqrt(in_features)
    w1 = jax.random.uniform(k1, (in_features, hidden_features), jnp.float32,
                            -bound1, bound1)
    b1 = jax.random.uniform(k2, (hidden_features,), jnp.float32, -bound1, bound1)

    bound2 = 1.0 / math.sqrt(hidden_features)
    w2 = jax.random.uniform(k3, (hidden_features, out_features), jnp.float32,
                            -bound2, bound2)
    b2 = jax.random.uniform(k4, (out_features,), jnp.float32, -bound2, bound2)

    out = jax.block_until_ready(cmlp_forward(x, w1, b1, w2, b2))

    ref = _reference(x, w1, b1, w2, b2)
    assert out.shape == (seq, batch, out_features)
    # bf16 MXU inputs (f32 accumulation) -> loosened tolerance vs the f32 reference.
    assert jnp.allclose(out, ref, atol=2e-2, rtol=2e-2), "mismatch vs reference"

    print("KERNEL_OK")
</pallas_src>

<mosaic_0001>
module attributes {stable_mosaic.version = 11 : i64} {
  func.func @_cmlp_kernel(%arg0: i32, %arg1: memref<32x32xbf16, #tpu.memory_space<vmem>>, %arg2: memref<32x64xbf16, #tpu.memory_space<vmem>>, %arg3: memref<1x64xf32, #tpu.memory_space<vmem>>, %arg4: memref<64x32xbf16, #tpu.memory_space<vmem>>, %arg5: memref<1x32xf32, #tpu.memory_space<vmem>>, %arg6: memref<32x32xf32, #tpu.memory_space<vmem>>) attributes {dimension_semantics = [#tpu.dimension_semantics<parallel>], iteration_bounds = array<i64: 1>, scalar_prefetch = 0 : i64, scratch_operands = 0 : i64, tpu.core_type = #tpu.core_type<tc>, window_params = [{transform_indices = @transform_0, window_bounds = array<i64: 32, 32>}, {pipeline_mode = #tpu.pipeline_mode<synchronous>, transform_indices = @transform_1, window_bounds = array<i64: 32, 64>}, {pipeline_mode = #tpu.pipeline_mode<synchronous>, transform_indices = @transform_2, window_bounds = array<i64: 1, 64>}, {pipeline_mode = #tpu.pipeline_mode<synchronous>, transform_indices = @transform_3, window_bounds = array<i64: 64, 32>}, {pipeline_mode = #tpu.pipeline_mode<synchronous>, transform_indices = @transform_4, window_bounds = array<i64: 1, 32>}, {transform_indices = @transform_5, window_bounds = array<i64: 32, 32>}]} {
    %c0 = arith.constant 0 : index
    %c0_0 = arith.constant 0 : index
    %0 = vector.load %arg1[%c0, %c0_0] : memref<32x32xbf16, #tpu.memory_space<vmem>>, vector<32x32xbf16>
    %c0_1 = arith.constant 0 : index
    %c0_2 = arith.constant 0 : index
    %1 = vector.load %arg2[%c0_1, %c0_2] : memref<32x64xbf16, #tpu.memory_space<vmem>>, vector<32x64xbf16>
    %cst = arith.constant dense<0.000000e+00> : vector<32x64xf32>
    %2 = tpu.matmul %0, %1, %cst {dimension_numbers = #tpu.dot_dimension_numbers<[1], [0], [0], [1], [0, 0, 1, 1], [], []>} : vector<32x32xbf16>, vector<32x64xbf16>, vector<32x64xf32> -> vector<32x64xf32>
    %c0_3 = arith.constant 0 : index
    %c0_4 = arith.constant 0 : index
    %3 = vector.load %arg3[%c0_3, %c0_4] : memref<1x64xf32, #tpu.memory_space<vmem>>, vector<1x64xf32>
    %4 = vector.broadcast %3 : vector<1x64xf32> to vector<32x64xf32>
    %5 = arith.addf %2, %4 : vector<32x64xf32>
    %cst_5 = arith.constant 5.000000e-01 : f32
    %6 = vector.broadcast %cst_5 : f32 to vector<32x64xf32>
    %7 = arith.mulf %6, %5 : vector<32x64xf32>
    %cst_6 = arith.constant 0.707106769 : f32
    %8 = vector.broadcast %cst_6 : f32 to vector<32x64xf32>
    %9 = arith.mulf %5, %8 : vector<32x64xf32>
    %10 = math.erf %9 : vector<32x64xf32>
    %cst_7 = arith.constant 1.000000e+00 : f32
    %11 = vector.broadcast %cst_7 : f32 to vector<32x64xf32>
    %12 = arith.addf %11, %10 : vector<32x64xf32>
    %13 = arith.mulf %7, %12 : vector<32x64xf32>
    %14 = arith.truncf %13 : vector<32x64xf32> to vector<32x64xbf16>
    %c0_8 = arith.constant 0 : index
    %c0_9 = arith.constant 0 : index
    %15 = vector.load %arg4[%c0_8, %c0_9] : memref<64x32xbf16, #tpu.memory_space<vmem>>, vector<64x32xbf16>
    %cst_10 = arith.constant dense<0.000000e+00> : vector<32x32xf32>
    %16 = tpu.matmul %14, %15, %cst_10 {dimension_numbers = #tpu.dot_dimension_numbers<[1], [0], [0], [1], [0, 0, 1, 1], [], []>} : vector<32x64xbf16>, vector<64x32xbf16>, vector<32x32xf32> -> vector<32x32xf32>
    %c0_11 = arith.constant 0 : index
    %c0_12 = arith.constant 0 : index
    %17 = vector.load %arg5[%c0_11, %c0_12] : memref<1x32xf32, #tpu.memory_space<vmem>>, vector<1x32xf32>
    %18 = vector.broadcast %17 : vector<1x32xf32> to vector<32x32xf32>
    %19 = arith.addf %16, %18 : vector<32x32xf32>
    %c0_13 = arith.constant 0 : index
    %c0_14 = arith.constant 0 : index
    %20 = vector.load %arg6[%c0_13, %c0_14] : memref<32x32xf32, #tpu.memory_space<vmem>>, vector<32x32xf32>
    tpu.vector_store %arg6[%c0_13, %c0_14], %19 {strides = array<i32>} : memref<32x32xf32, #tpu.memory_space<vmem>>, vector<32x32xf32>,
    return
  }
  func.func @transform_0(%arg0: i32) -> (i32, i32) {
    %c0_i32 = arith.constant 0 : i32
    %c0_i32_0 = arith.constant 0 : i32
    return %arg0, %c0_i32 : i32, i32
  }
  func.func @transform_1(%arg0: i32) -> (i32, i32) {
    %c0_i32 = arith.constant 0 : i32
    %c0_i32_0 = arith.constant 0 : i32
    %c0_i32_1 = arith.constant 0 : i32
    return %c0_i32, %c0_i32_0 : i32, i32
  }
  func.func @transform_2(%arg0: i32) -> (i32, i32) {
    %c0_i32 = arith.constant 0 : i32
    %c0_i32_0 = arith.constant 0 : i32
    %c0_i32_1 = arith.constant 0 : i32
    return %c0_i32, %c0_i32_0 : i32, i32
  }
  func.func @transform_3(%arg0: i32) -> (i32, i32) {
    %c0_i32 = arith.constant 0 : i32
    %c0_i32_0 = arith.constant 0 : i32
    %c0_i32_1 = arith.constant 0 : i32
    return %c0_i32, %c0_i32_0 : i32, i32
  }
  func.func @transform_4(%arg0: i32) -> (i32, i32) {
    %c0_i32 = arith.constant 0 : i32
    %c0_i32_0 = arith.constant 0 : i32
    %c0_i32_1 = arith.constant 0 : i32
    return %c0_i32, %c0_i32_0 : i32, i32
  }
  func.func @transform_5(%arg0: i32) -> (i32, i32) {
    %c0_i32 = arith.constant 0 : i32
    %c0_i32_0 = arith.constant 0 : i32
    return %arg0, %c0_i32 : i32, i32
  }
}

</mosaic_0001>

<bundles_post_ra>
// kernel: tpu_custom_call.1
= control target key start
LH: loop header
LB: loop body
LE: loop exit
PB: predicated region body
PF: predicated region fallthrough
CT: control target
= control target key end

     0   :  { %s622_s0 = inlined_call_operand.vmem [shape: bf16[32,32], index: 0, kind: input, shape index: {}]   ;;  %s623_s1 = inlined_call_operand.vmem [shape: bf16[32,64], index: 1, kind: input, shape index: {}]   ;;  %s624_s2 = inlined_call_operand.vmem [shape: f32[1,64], index: 2, kind: input, shape index: {}]   ;;  %s625_s3 = inlined_call_operand.vmem [shape: bf16[64,32], index: 3, kind: input, shape index: {}]   ;;  %s626_s4 = inlined_call_operand.vmem [shape: f32[1,32], index: 4, kind: input, shape index: {}]   ;;  %s627_s5 = inlined_call_operand.hbm [shape: f32[32,32], index: 5, kind: output, shape index: {}]  }
   0x1   :  { %v387_v0 = vld [vmem:[%s623_s1 + $0x8] sm:$0xff]  ;;  %v386_v1 = vld [vmem:[%s623_s1] sm:$0xff] }
   0x2   :  { %69 = vmatpush.bf16.msra.mxu0 %v387_v0  ;;  %392 = vmatpush.bf16.msra.mxu3 %v387_v0 }
   0x3   :  { %10 = vsyncpa [#allocation3], 0  ;;  %v384_v2 = vld [vmem:[%s622_s0] sm:$0xff]  ;;  %v385_v3 = vld [vmem:[%s622_s0 + $0x8] sm:$0xff]  ;;  %vm56_vm0 = vcmask 261120   ;;  %s437_s9 = smov [#allocation2]  }
   0x4   :  { %v401_v4 = vld [vmem:[%s624_s2] ss:$0 sm:$0xff]  ;;  %v391_v51 = vld [vmem:[%s625_s3 + $0x18] sm:$0xff]  ;;  %v390_v61 = vld [vmem:[%s625_s3 + $0x10] sm:$0xff]  ;;  %s330_s10 = sshll.u32 %s437_s9, 4  ;;  %s332_s13 = sshll.u32 %s627_s5, 4  ;;  %s331_s10 = int_to_ptr.vmem [resolvable:$true] %s330_s10  ;;  %s333_s13 = int_to_ptr.hbm [resolvable:$true] %s332_s13 }
   0x5   :  { %307 = vmatpush.bf16.msra.mxu1 %v391_v51  ;;  %394 = vmatpush.bf16.msra.mxu2 %v391_v51  ;;  %s439_s14 = smov 8  }
   0x6   :  { %70 = vmatpush.bf16.msra.mxu0 %v386_v1  ;;  %393 = vmatpush.bf16.msra.mxu3 %v386_v1 }
   0x9   :  { %360 = vmatmul.msk.bf16.vlgmr.msra.gmra.mxu0 %vm56_vm0, %v384_v2  ;;  %361 = vmatmul.msk.bf16.vlgmr.msra.gmra.mxu3 %vm56_vm0, %v385_v3 }
   0xa   :  { %308 = vmatpush.bf16.msra.mxu1 %v390_v61  ;;  %395 = vmatpush.bf16.msra.mxu2 %v390_v61 }
  0x86   :  { %v72_v5 = vpop.f32.mrf.mxu0 }
  0x87   :  { %v487_v6 = vadd.f32 %v401_v4, %v72_v5 }
  0x89   :  { %v490_v7 = vmul.f32 0.70710677, %v487_v6 }
  0x8b   :  { %v90_v8 = vmul.f32 %v490_v7, %v490_v7 }
  0x8c   :  { %v77_v9 = vpop.f32.mrf.mxu3 }
  0x8d   :  { %v494_v10 = vmin.f32 %v90_v8, 16.0  ;;  %v496_v11 = vadd.f32 %v401_v4, %v77_v9  ;;  %v389_v8 = vld [vmem:[%s625_s3 + $0x8] sm:$0xff] }
  0x8e   :  { %v74_v12 = vpop.f32.mrf.mxu0  ;;  %309 = vmatpush.bf16.msra.mxu1 %v389_v8  ;;  %396 = vmatpush.bf16.msra.mxu2 %v389_v8 }
  0x8f   :  { %v92_v13 = vmul.f32 2.1237322e-06, %v494_v10  ;;  %v103_v14 = vmul.f32 3.8918573e-05, %v494_v10  ;;  %v500_v15 = vadd.f32 %v401_v4, %v74_v12  ;;  %v503_v16 = vmul.f32 0.70710677, %v496_v11 }
  0x91   :  { %v104_v17 = vadd.f32 0.001143296, %v103_v14  ;;  %v93_v18 = vadd.f32 0.00028619796, %v92_v13  ;;  %v170_v19 = vmul.f32 %v503_v16, %v503_v16  ;;  %v508_v20 = vmul.f32 0.70710677, %v500_v15 }
  0x93   :  { %v105_v21 = vmul.f32 %v104_v17, %v494_v10  ;;  %v511_v22 = vmin.f32 %v170_v19, 16.0  ;;  %v130_v23 = vmul.f32 %v508_v20, %v508_v20  ;;  %v94_v27 = vmul.f32 %v93_v18, %v494_v10 }
  0x94   :  { %v79_v24 = vpop.f32.mrf.mxu3 }
  0x95   :  { %v106_v25 = vadd.f32 0.014752088, %v105_v21  ;;  %v515_v26 = vadd.f32 %v401_v4, %v79_v24  ;;  %v183_v28 = vmul.f32 3.8918573e-05, %v511_v22  ;;  %v519_v29 = vmin.f32 %v130_v23, 16.0 }
  0x96   :  { %v172_v32 = vmul.f32 2.1237322e-06, %v511_v22  ;;  %v95_v38 = vadd.f32 0.0036580483, %v94_v27  ;;  %v388_v27 = vld [vmem:[%s625_s3] sm:$0xff] }
  0x97   :  { %v107_v30 = vmul.f32 %v106_v25, %v494_v10  ;;  %v523_v31 = vmul.f32 0.70710677, %v515_v26  ;;  %v184_v33 = vadd.f32 0.001143296, %v183_v28  ;;  %v132_v34 = vmul.f32 2.1237322e-06, %v519_v29  ;;  %310 = vmatpush.bf16.msra.mxu1 %v388_v27  ;;  %397 = vmatpush.bf16.msra.mxu2 %v388_v27 }
  0x98   :  { %v143_v36 = vmul.f32 3.8918573e-05, %v519_v29  ;;  %v173_v44 = vadd.f32 0.00028619796, %v172_v32  ;;  %v96_v52 = vmul.f32 %v95_v38, %v494_v10 }
  0x99   :  { %v108_v35 = vadd.f32 0.112945676, %v107_v30  ;;  %v210_v37 = vmul.f32 %v523_v31, %v523_v31  ;;  %v185_v39 = vmul.f32 %v184_v33, %v511_v22  ;;  %v133_v41 = vadd.f32 0.00028619796, %v132_v34 }
  0x9a   :  { %v144_v42 = vadd.f32 0.001143296, %v143_v36  ;;  %v174_v56 = vmul.f32 %v173_v44, %v511_v22  ;;  %v97_v0 = vadd.f32 0.05243302, %v96_v52 }
  0x9b   :  { %v109_v40 = vmul.f32 %v108_v35, %v494_v10  ;;  %v532_v43 = vmin.f32 %v210_v37, 16.0  ;;  %v186_v45 = vadd.f32 0.014752088, %v185_v39  ;;  %v134_v54 = vmul.f32 %v133_v41, %v519_v29 }
  0x9c   :  { %v145_v47 = vmul.f32 %v144_v42, %v519_v29  ;;  %v175_v3 = vadd.f32 0.0036580483, %v174_v56  ;;  %v98_v13 = vmul.f32 %v97_v0, %v494_v10 }
  0x9d   :  { %v110_v46 = vadd.f32 0.4994258, %v109_v40  ;;  %v187_v48 = vmul.f32 %v186_v45, %v511_v22  ;;  %v212_v49 = vmul.f32 2.1237322e-06, %v532_v43  ;;  %v223_v50 = vmul.f32 3.8918573e-05, %v532_v43 }
  0x9e   :  { %v146_v55 = vadd.f32 0.014752088, %v145_v47  ;;  %v135_v1 = vadd.f32 0.0036580483, %v134_v54  ;;  %v176_v19 = vmul.f32 %v175_v3, %v511_v22  ;;  %v99_v32 = vadd.f32 0.18741608, %v98_v13 }
  0x9f   :  { %v111_v53 = vmul.f32 %v110_v46, %v494_v10  ;;  %v188_v57 = vadd.f32 0.112945676, %v187_v48  ;;  %v224_v58 = vadd.f32 0.001143296, %v223_v50  ;;  %v213_v63 = vadd.f32 0.00028619796, %v212_v49 }
  0xa0   :  { %v147_v60 = vmul.f32 %v146_v55, %v519_v29  ;;  %v136_v14 = vmul.f32 %v135_v1, %v519_v29  ;;  %v177_v35 = vadd.f32 0.05243302, %v176_v19  ;;  %v100_v42 = vmul.f32 %v99_v32, %v494_v10 }
  0xa1   :  { %v545_v59 = vadd.f32 1.0, %v111_v53  ;;  %v189_v62 = vmul.f32 %v188_v57, %v511_v22  ;;  %v225_v2 = vmul.f32 %v224_v58, %v532_v43  ;;  %v214_v12 = vmul.f32 %v213_v63, %v532_v43 }
  0xa2   :  { %v148_v5 = vadd.f32 0.112945676, %v147_v60  ;;  %v137_v33 = vadd.f32 0.05243302, %v136_v14  ;;  %v178_v47 = vmul.f32 %v177_v35, %v511_v22  ;;  %v101_v54 = vadd.f32 1.1283791, %v100_v42 }
  0xa3   :  { %403 = vrcp.f32 %v545_v59  ;;  %v190_v4 = vadd.f32 0.4994258, %v189_v62  ;;  %v226_v18 = vadd.f32 0.014752088, %v225_v2  ;;  %v215_v30 = vadd.f32 0.0036580483, %v214_v12 }
  0xa4   :  { %v149_v17 = vmul.f32 %v148_v5, %v519_v29  ;;  %v138_v44 = vmul.f32 %v137_v33, %v519_v29  ;;  %v124_v48 = vand.u32 2147483648, %v545_v59  ;;  %vm118_vm2 = vweird.f32 %v545_v59 }
  0xa5   :  { %v191_v9 = vmul.f32 %v190_v4, %v511_v22  ;;  %v227_v25 = vmul.f32 %v226_v18, %v532_v43  ;;  %v216_v40 = vmul.f32 %v215_v30, %v532_v43  ;;  %v122_v50 = vand.u32 2147483647, %v545_v59 }
  0xa6   :  { %v150_v24 = vadd.f32 0.4994258, %v149_v17  ;;  %v139_v53 = vadd.f32 0.18741608, %v138_v44  ;;  %v179_v56 = vadd.f32 0.18741608, %v178_v47  ;;  %v102_v2 = vmul.f32 %v101_v54, %v490_v7 }
  0xa7   :  { %v563_v21 = vadd.f32 1.0, %v191_v9  ;;  %v228_v37 = vadd.f32 0.112945676, %v227_v25  ;;  %v217_v51 = vadd.f32 0.05243302, %v216_v40  ;;  %v125_v58 = vor.u32 1.1754944e-38, %v124_v48 }
  0xa8   :  { %v151_v36 = vmul.f32 %v150_v24, %v519_v29  ;;  %vm123_vm4 = vcmp.eq.f32.partialorder %v122_v50, 8.507059e+37  ;;  %v180_v3 = vmul.f32 %v179_v56, %v511_v22 }
  0xa9   :  { %v404_v23 = vpop.eup %403  ;;  %405 = vrcp.f32 %v563_v21  ;;  %v229_v41 = vmul.f32 %v228_v37, %v532_v43  ;;  %v218_v62 = vmul.f32 %v217_v51, %v532_v43  ;;  %vm198_vm5 = vweird.f32 %v563_v21 }
  0xaa   :  { %v114_v28 = vmul.f32 %v404_v23, %v545_v59  ;;  %v572_v39 = vadd.f32 1.0, %v151_v36  ;;  %vm119_vm1 = vweird.f32 %v404_v23  ;;  %v140_v59 = vmul.f32 %v139_v53, %v519_v29 }
  0xab   :  { %v230_v52 = vadd.f32 0.4994258, %v229_v41  ;;  %vm120_vm3 = vmor %vm118_vm2, %vm119_vm1  ;;  %v202_v5 = vand.u32 2147483647, %v563_v21  ;;  %v204_v12 = vand.u32 2147483648, %v563_v21  ;;  %vm296_vm2 = vcmask 523264  }
  0xac   :  { %v115_v34 = vsub.f32 1.0, %v114_v28  ;;  %407 = vrcp.f32 %v572_v39  ;;  %v164_v13 = vand.u32 2147483648, %v572_v39  ;;  %v219_v29 = vadd.f32 0.18741608, %v218_v62  ;;  %v402_v62 = vld [vmem:[%s626_s4] ss:$0 sm:$0xff] }
  0xad   :  { %v231_v57 = vmul.f32 %v230_v52, %v532_v43  ;;  %v141_v14 = vadd.f32 1.1283791, %v140_v59  ;;  %v162_v7 = vand.u32 2147483647, %v572_v39  ;;  %v181_v22 = vadd.f32 1.1283791, %v180_v3 }
  0xae   :  { %v116_v38 = vmul.f32 %v404_v23, %v115_v34  ;;  %vm203_vm9 = vcmp.eq.f32.partialorder %v202_v5, 8.507059e+37  ;;  %vm158_vm10 = vweird.f32 %v572_v39  ;;  %v205_v27 = vor.u32 1.1754944e-38, %v204_v12  ;;  %s438_s4 = smov 128  }
  0xaf   :  { %v406_v45 = vpop.eup %405  ;;  %v232_v63 = vadd.f32 1.0, %v231_v57  ;;  %v165_v28 = vor.u32 1.1754944e-38, %v164_v13  ;;  %v220_v30 = vmul.f32 %v219_v29, %v532_v43  ;;  %vm163_vm12 = vcmp.eq.f32.partialorder %v162_v7, 8.507059e+37 }
  0xb0   :  { %v117_v46 = vadd.f32 %v404_v23, %v116_v38  ;;  %v194_v49 = vmul.f32 %v406_v45, %v563_v21  ;;  %vm199_vm6 = vweird.f32 %v406_v45  ;;  %v142_v21 = vmul.f32 %v141_v14, %v508_v20 }
  0xb1   :  { %409 = vrcp.f32 %v232_v63  ;;  %vm597_vm8 = vmor %vm198_vm5, %vm199_vm6  ;;  %v182_v36 = vmul.f32 %v181_v22, %v503_v16  ;;  %v242_v41 = vand.u32 2147483647, %v232_v63  ;;  %v244_v42 = vand.u32 2147483648, %v232_v63 }
  0xb2   :  { %v195_v10 = vsub.f32 1.0, %v194_v49  ;;  %v121_v55 = vsel %vm120_vm3, %v404_v23, %v117_v46  ;;  %v408_v61 = vpop.eup %407  ;;  %v82_v43 = vmul.f32 0.5, %v487_v6  ;;  %v83_v20 = vmul.f32 0.5, %v500_v15 }
  0xb3   :  { %v126_v0 = vsel %vm123_vm4, %v125_v58, %v121_v55  ;;  %v154_v1 = vmul.f32 %v408_v61, %v572_v39  ;;  %vm159_vm7 = vweird.f32 %v408_v61  ;;  %v221_v39 = vadd.f32 1.1283791, %v220_v30 }
  0xb4   :  { %v196_v60 = vmul.f32 %v406_v45, %v195_v10  ;;  %v127_v9 = vmul.f32 %v126_v0, %v102_v2  ;;  %vm160_vm11 = vmor %vm158_vm10, %vm159_vm7  ;;  %vm238_vm14 = vweird.f32 %v232_v63  ;;  %v245_v50 = vor.u32 1.1754944e-38, %v244_v42 }
  0xb5   :  { %v155_v8 = vsub.f32 1.0, %v154_v1  ;;  %v222_v16 = vmul.f32 %v221_v39, %v523_v31  ;;  %vm243_vm1 = vcmp.eq.f32.partialorder %v242_v41, 8.507059e+37  ;;  %v84_v15 = vmul.f32 0.5, %v496_v11 }
  0xb6   :  { %v197_v4 = vadd.f32 %v406_v45, %v196_v60  ;;  %v362_v25 = vclamps-f32 %v127_v9, 1.0  ;;  %v85_v57 = vmul.f32 0.5, %v515_v26 }
  0xb7   :  { %v156_v17 = vmul.f32 %v408_v61, %v155_v8  ;;  %v410_v24 = vpop.eup %409 }
  0xb8   :  { %v201_v19 = vsel %vm597_vm8, %v406_v45, %v197_v4  ;;  %v234_v33 = vmul.f32 %v410_v24, %v232_v63  ;;  %v250_v40 = vadd.f32 1.0, %v362_v25  ;;  %vm239_vm13 = vweird.f32 %v410_v24 }
  0xb9   :  { %v157_v23 = vadd.f32 %v408_v61, %v156_v17  ;;  %v206_v34 = vsel %vm203_vm9, %v205_v27, %v201_v19  ;;  %vm240_vm15 = vmor %vm238_vm14, %vm239_vm13 }
  0xba   :  { %v235_v38 = vsub.f32 1.0, %v234_v33  ;;  %v207_v44 = vmul.f32 %v206_v34, %v182_v36  ;;  %v254_v49 = vmul.f32 %v250_v40, %v82_v43 }
  0xbb   :  { %v161_v32 = vsel %vm160_vm11, %v408_v61, %v157_v23 }
  0xbc   :  { %v166_v35 = vsel %vm163_vm12, %v165_v28, %v161_v32  ;;  %v236_v46 = vmul.f32 %v410_v24, %v235_v38  ;;  %v364_v51 = vclamps-f32 %v207_v44, 1.0 }
  0xbd   :  { %v167_v37 = vmul.f32 %v166_v35, %v142_v21 }
  0xbe   :  { %v237_v48 = vadd.f32 %v410_v24, %v236_v46  ;;  %v252_v56 = vadd.f32 1.0, %v364_v51 }
  0xbf   :  { %v363_v45 = vclamps-f32 %v167_v37, 1.0 }
  0xc0   :  { %v241_v10 = vsel %vm240_vm15, %v410_v24, %v237_v48  ;;  %v256_v60 = vmul.f32 %v252_v56, %v84_v15 }
  0xc1   :  { %v251_v47 = vadd.f32 1.0, %v363_v45  ;;  %v246_v53 = vsel %vm243_vm1, %v245_v50, %v241_v10 }
  0xc2   :  { %v247_v54 = vmul.f32 %v246_v53, %v222_v16 }
  0xc3   :  { %v255_v52 = vmul.f32 %v251_v47, %v83_v20 }
  0xc4   :  { %v365_v6 = vclamps-f32 %v247_v54, 1.0 }
  0xc5   :  { %v258_v55 = vpack.c.bf16 %v255_v52, %v254_v49 }
  0xc6   :  { %v253_v58 = vadd.f32 1.0, %v365_v6 }
  0xc7   :  { %382 = vmatmul.msk.bf16.vlgmr.msra.gmra.mxu1 %vm296_vm2, %v258_v55 }
  0xc8   :  { %v257_v31 = vmul.f32 %v253_v58, %v85_v57 }
  0xca   :  { %v259_v61 = vpack.c.bf16 %v257_v31, %v256_v60 }
  0xcc   :  { %383 = vmatmul.msk.bf16.vlgmr.msra.gmra.mxu2 %vm296_vm2, %v259_v61 }
 0x144   :  { %v312_v63 = vpop.f32.mrf.mxu1 }
 0x145   :  { %v313_v0 = vadd.f32 %v402_v62, %v312_v63 }
 0x147   :  { %322 = vst.msk [vmem:[#allocation2] sm:$0xff] %vm56_vm0, %v313_v0 }
 0x14c   :  { %v314_v59 = vpop.f32.mrf.mxu1 }
 0x14d   :  { %v315_v1 = vadd.f32 %v402_v62, %v314_v59 }
 0x14f   :  { %323 = vst.msk [vmem:[#allocation2 + $0x8] sm:$0xff] %vm56_vm0, %v315_v1  ;;  %v317_v11 = vpop.f32.mrf.mxu2 }
 0x150   :  { %v318_v2 = vadd.f32 %v402_v62, %v317_v11 }
 0x152   :  { %324 = vst.msk [vmem:[#allocation2 + $0x10] sm:$0xff] %vm56_vm0, %v318_v2 }
 0x157   :  { %v319_v26 = vpop.f32.mrf.mxu2 }
 0x158   :  { %v320_v3 = vadd.f32 %v402_v62, %v319_v26 }
 0x15a   :  { %325 = vst.msk [vmem:[#allocation2 + $0x18] sm:$0xff] %vm56_vm0, %v320_v3 }
 0x15b   :  { %338 = dma.vmem_to_hbm [thread:$0]  %s331_s10, 512, %s333_s13, [#allocation3], %s438_s4, %s438_s4, %s439_s14  }
 0x15c   :  { %435 = dma.done.wait [#allocation3], 512  }
 0x15d   :  { %436 = vsyncadd [#allocation3], 4294966784 }
 0x15e   :  { %343 = vsyncpa [#allocation3], 1 }

</bundles_post_ra>
